<compile_context>
chip_gen: v7x
topology: tpu7x:2x2x1
jax: 0.10.0
libtpu: 0.0.40
codegen_flags: <defaults>
</compile_context>

<pallas_src>
import jax
import jax.numpy as jnp
from jax import lax
from jax.experimental import pallas as pl
from jax.experimental.pallas import tpu as pltpu

_LANES = 128  # lane width; fc output (2) is padded up to this for the matmul


def _round_up(x, m):
    return ((x + m - 1) // m) * m


def _choose_tb(batch):
    """Batch-tile rows: multiple of 8, <= 256, >= 2 grid steps when possible."""
    b8 = _round_up(batch, 8)
    if b8 <= 8:
        return 8
    return min(256, _round_up((b8 + 1) // 2, 8))


def _vmem_budget_bytes():
    """~75% of physical VMEM (48 MiB on v7x, 96 MiB on v5e/v6e)."""
    phys = 64 * 1024 * 1024  # conservative default: v7x per-core physical VMEM
    try:
        info = pltpu.get_tpu_info()
        phys = int(getattr(info, "vmem_capacity_bytes", phys))
    except Exception:
        pass
    return (phys * 3) // 4


# ----------------------------------------------------------------------------
# Fast path: embedding table resident in VMEM, in-kernel dynamic-row gather.
# ----------------------------------------------------------------------------
def _fc_vmem_kernel(ids_ref, table_ref, w_ref, b_ref, o_ref, gathered_ref):
    # ids_ref     : (B_pad,)   int32 SMEM (scalar prefetch)  — token ids x[:, 0]
    # table_ref   : (V, D)     native dtype, VMEM-resident embedding table
    # w_ref       : (D, 128)   f32 VMEM — fc weight^T, zero-padded lanes
    # b_ref       : (1, 128)   f32 VMEM — fc bias, zero-padded lanes
    # o_ref       : (TB, 2)    f32 output block (slim — last dim == full dim)
    # gathered_ref: (TB, D)    VMEM scratch, native table dtype
    tb = gathered_ref.shape[0]
    base = pl.program_id(0) * tb

    def gather_row(r, carry):
        row = ids_ref[base + r]
        gathered_ref[pl.ds(r, 1), :] = table_ref[pl.ds(row, 1), :]
        return carry

    lax.fori_loop(0, tb, gather_row, 0, unroll=8)

    # TODO(synk): training-mode dropout (p=0.1) not applied; eval semantics.
    logits = (
        jnp.dot(gathered_ref[...].astype(jnp.float32), w_ref[...],
                preferred_element_type=jnp.float32)
        + b_ref[...]
    )
    o_ref[...] = logits[:, : o_ref.shape[1]]


# ----------------------------------------------------------------------------
# Large-V path: table in HBM, row-gather DMAs double-buffered across grid steps.
# ----------------------------------------------------------------------------
def _fc_hbm_kernel(ids_ref, table_ref, w_ref, b_ref, o_ref, gathered_ref, sems_ref):
    # gathered_ref: (2, TB, D) VMEM double buffer; sems_ref: DMA semaphores (2,)
    tb = gathered_ref.shape[1]
    step = pl.program_id(0)
    n_steps = pl.num_programs(0)
    slot = step % 2
    next_slot = (step + 1) % 2

    def issue_tile(tile_idx, buf_slot):
        base = tile_idx * tb

        def issue_row(r, carry):
            row = ids_ref[base + r]
            pltpu.make_async_copy(
                table_ref.at[row], gathered_ref.at[buf_slot, r], sems_ref.at[buf_slot]
            ).start()
            return carry

        lax.fori_loop(0, tb, issue_row, 0, unroll=8)

    # Prologue: tile 0's gather issued at step 0 (its latency exposed once).
    @pl.when(step == 0)
    def _():
        issue_tile(0, 0)

    # Prefetch next tile's rows into the other slot BEFORE waiting on this one,
    # so its gather latency hides behind this step's wait/compute/writeback.
    @pl.when(step + 1 < n_steps)
    def _():
        issue_tile(step + 1, next_slot)

    # Wait for this tile's tb row copies: one shared semaphore per slot; every
    # copy moves an identical (D,) row, so tb identical-size waits drain it.
    def wait_row(r, carry):
        pltpu.make_async_copy(
            table_ref.at[0], gathered_ref.at[slot, 0], sems_ref.at[slot]
        ).wait()
        return carry

    lax.fori_loop(0, tb, wait_row, 0, unroll=8)

    # TODO(synk): training-mode dropout (p=0.1) not applied; eval semantics.
    logits = (
        jnp.dot(gathered_ref[slot].astype(jnp.float32), w_ref[...],
                preferred_element_type=jnp.float32)
        + b_ref[...]
    )
    o_ref[...] = logits[:, : o_ref.shape[1]]


def fc_forward(x, embedding_matrix, fc_weight, fc_bias, *, force_hbm_path=False):
    """FC.forward. x: (B, S) int token ids -> (B, 2) f32 logits."""
    V, D = embedding_matrix.shape
    B = x.shape[0]
    n_out = fc_weight.shape[0]  # == 2

    # Only x[:, 0] is consumed (the module uses embedding[:, 0]).  Clamp so the
    # gather can never index out of range (PyTorch's Embedding would raise).
    ids = jnp.clip(x[:, 0].astype(jnp.int32), 0, V - 1)

    TB = _choose_tb(B)
    B_pad = _round_up(B, TB)
    ids_pad = jnp.zeros((B_pad,), jnp.int32).at[:B].set(ids)

    # fc weight/bias padded to a lane-dense (., 128) layout for the matmul.
    w_pad = (
        jnp.zeros((D, _LANES), jnp.float32)
        .at[:, :n_out]
        .set(jnp.transpose(fc_weight).astype(jnp.float32))
    )
    b_pad = jnp.zeros((1, _LANES), jnp.float32).at[:, :n_out].set(
        fc_bias.astype(jnp.float32)
    )

    # Table kept in its native dtype — no wrapper-side astype pass over HBM.
    table = embedding_matrix
    table_bytes = V * D * table.dtype.itemsize

    budget = _vmem_budget_bytes()
    # Working set besides the table: padded w/b, double-buffered output blocks,
    # gather scratch, plus slack.  Table budgeted at 2x in case the resident
    # input BlockSpec is double-buffered by the pipeline.
    working = (D * _LANES + _LANES) * 4 + 2 * TB * _LANES * 4 + 2 * TB * D * 4 + (1 << 20)
    use_resident = (not force_hbm_path) and (2 * table_bytes + working <= budget)

    grid = (B_pad // TB,)
    out_shape = jax.ShapeDtypeStruct((B_pad, n_out), jnp.float32)

    if use_resident:
        out_padded = pl.pallas_call(
            _fc_vmem_kernel,
            out_shape=out_shape,
            grid_spec=pltpu.PrefetchScalarGridSpec(
                num_scalar_prefetch=1,  # ids -> SMEM
                grid=grid,
                in_specs=[
                    pl.BlockSpec((V, D), lambda i, _ids: (0, 0)),       # resident table
                    pl.BlockSpec((D, _LANES), lambda i, _ids: (0, 0)),  # w^T
                    pl.BlockSpec((1, _LANES), lambda i, _ids: (0, 0)),  # bias
                ],
                out_specs=pl.BlockSpec((TB, n_out), lambda i, _ids: (i, 0)),
                scratch_shapes=[pltpu.VMEM((TB, D), table.dtype)],
            ),
            compiler_params=pltpu.CompilerParams(
                dimension_semantics=("parallel",),      # megacore on v7x
                vmem_limit_bytes=int(budget),           # raise v5e's 16 MiB default
            ),
        )(ids_pad, table, w_pad, b_pad)
    else:
        out_padded = pl.pallas_call(
            _fc_hbm_kernel,
            out_shape=out_shape,
            grid_spec=pltpu.PrefetchScalarGridSpec(
                num_scalar_prefetch=1,
                grid=grid,
                in_specs=[
                    pl.BlockSpec(memory_space=pl.ANY),                  # table in HBM
                    pl.BlockSpec((D, _LANES), lambda i, _ids: (0, 0)),
                    pl.BlockSpec((1, _LANES), lambda i, _ids: (0, 0)),
                ],
                out_specs=pl.BlockSpec((TB, n_out), lambda i, _ids: (i, 0)),
                scratch_shapes=[
                    pltpu.VMEM((2, TB, D), table.dtype),    # double-buffered gather
                    pltpu.SemaphoreType.DMA((2,)),          # one shared sem per slot
                ],
            ),
            compiler_params=pltpu.CompilerParams(
                # Gathers are double-buffered across grid steps (state carried in
                # scratch/semaphores), so the batch axis must stay sequential.
                dimension_semantics=("arbitrary",),
            ),
        )(ids_pad, table, w_pad, b_pad)

    return out_padded[:B, :]


if __name__ == "__main__":
    key = jax.random.PRNGKey(0)
    k_emb, k_w, k_b, k_x, k_x2 = jax.random.split(key, 5)

    V, D = 64, 32          # vocab size, embedding dim
    B, S = 2, 8            # batch, sequence length

    # Deterministic synthetic parameters (shapes match the module's __init__).
    embedding_matrix = jax.random.normal(k_emb, (V, D), dtype=jnp.float32)
    bound = 1.0 / (D ** 0.5)  # nn.Linear default init range
    fc_weight = jax.random.uniform(k_w, (2, D), minval=-bound, maxval=bound,
                                   dtype=jnp.float32)
    fc_bias = jax.random.uniform(k_b, (2,), minval=-bound, maxval=bound,
                                 dtype=jnp.float32)

    x = jax.random.randint(k_x, (B, S), 0, V, dtype=jnp.int32)
    ref = embedding_matrix[x[:, 0]] @ fc_weight.T + fc_bias

    # Fast path (table resident in VMEM).
    out = jax.block_until_ready(fc_forward(x, embedding_matrix, fc_weight, fc_bias))
    assert out.shape == (B, 2)
    assert jnp.allclose(out, ref, atol=1e-5), (out, ref)

    # Large-vocab path (HBM table, double-buffered DMA gather) forced for test.
    out_hbm = jax.block_until_ready(
        fc_forward(x, embedding_matrix, fc_weight, fc_bias, force_hbm_path=True))
    assert jnp.allclose(out_hbm, ref, atol=1e-5), (out_hbm, ref)

    # Larger batch: exercises multi-tile grid + tail padding on both paths.
    B2 = 20
    x2 = jax.random.randint(k_x2, (B2, S), 0, V, dtype=jnp.int32)
    ref2 = embedding_matrix[x2[:, 0]] @ fc_weight.T + fc_bias
    out2 = jax.block_until_ready(fc_forward(x2, embedding_matrix, fc_weight, fc_bias))
    out2h = jax.block_until_ready(
        fc_forward(x2, embedding_matrix, fc_weight, fc_bias, force_hbm_path=True))
    assert jnp.allclose(out2, ref2, atol=1e-5), (out2, ref2)
    assert jnp.allclose(out2h, ref2, atol=1e-5), (out2h, ref2)

    print("KERNEL_OK")
</pallas_src>

<mosaic_0001>
module attributes {stable_mosaic.version = 11 : i64} {
  func.func @_fc_vmem_kernel(%arg0: i32, %arg1: memref<8xi32, #tpu.memory_space<smem>>, %arg2: memref<64x32xf32, #tpu.memory_space<vmem>>, %arg3: memref<32x128xf32, #tpu.memory_space<vmem>>, %arg4: memref<1x128xf32, #tpu.memory_space<vmem>>, %arg5: memref<8x2xf32, #tpu.memory_space<vmem>>, %arg6: memref<8x32xf32, #tpu.memory_space<vmem>>) attributes {dimension_semantics = [#tpu.dimension_semantics<parallel>], iteration_bounds = array<i64: 1>, scalar_prefetch = 1 : i64, scratch_operands = 1 : i64, tpu.core_type = #tpu.core_type<tc>, window_params = [{pipeline_mode = #tpu.pipeline_mode<synchronous>, transform_indices = @transform_0, window_bounds = array<i64: 64, 32>}, {pipeline_mode = #tpu.pipeline_mode<synchronous>, transform_indices = @transform_1, window_bounds = array<i64: 32, 128>}, {pipeline_mode = #tpu.pipeline_mode<synchronous>, transform_indices = @transform_2, window_bounds = array<i64: 1, 128>}, {transform_indices = @transform_3, window_bounds = array<i64: 8, 2>}]} {
    %c8_i32 = arith.constant 8 : i32
    %0 = arith.muli %arg0, %c8_i32 : i32
    %c0_i32 = arith.constant 0 : i32
    %1 = arith.addi %0, %c0_i32 : i32
    %2 = arith.index_cast %1 : i32 to index
    %3 = memref.load %arg1[%2] : memref<8xi32, #tpu.memory_space<smem>>
    %4 = arith.index_cast %3 : i32 to index
    %c0 = arith.constant 0 : index
    %5 = vector.load %arg2[%4, %c0] : memref<64x32xf32, #tpu.memory_space<vmem>>, vector<1x32xf32>
    %6 = arith.index_cast %c0_i32 : i32 to index
    %c0_0 = arith.constant 0 : index
    %7 = vector.load %arg6[%6, %c0_0] : memref<8x32xf32, #tpu.memory_space<vmem>>, vector<1x32xf32>
    tpu.vector_store %arg6[%6, %c0_0], %5 {strides = array<i32>} : memref<8x32xf32, #tpu.memory_space<vmem>>, vector<1x32xf32>,
    %c1_i32 = arith.constant 1 : i32
    %8 = arith.addi %0, %c1_i32 : i32
    %9 = arith.index_cast %8 : i32 to index
    %10 = memref.load %arg1[%9] : memref<8xi32, #tpu.memory_space<smem>>
    %11 = arith.index_cast %10 : i32 to index
    %c0_1 = arith.constant 0 : index
    %12 = vector.load %arg2[%11, %c0_1] : memref<64x32xf32, #tpu.memory_space<vmem>>, vector<1x32xf32>
    %13 = arith.index_cast %c1_i32 : i32 to index
    %c0_2 = arith.constant 0 : index
    %14 = vector.load %arg6[%13, %c0_2] : memref<8x32xf32, #tpu.memory_space<vmem>>, vector<1x32xf32>
    tpu.vector_store %arg6[%13, %c0_2], %12 {strides = array<i32>} : memref<8x32xf32, #tpu.memory_space<vmem>>, vector<1x32xf32>,
    %c2_i32 = arith.constant 2 : i32
    %15 = arith.addi %0, %c2_i32 : i32
    %16 = arith.index_cast %15 : i32 to index
    %17 = memref.load %arg1[%16] : memref<8xi32, #tpu.memory_space<smem>>
    %18 = arith.index_cast %17 : i32 to index
    %c0_3 = arith.constant 0 : index
    %19 = vector.load %arg2[%18, %c0_3] : memref<64x32xf32, #tpu.memory_space<vmem>>, vector<1x32xf32>
    %20 = arith.index_cast %c2_i32 : i32 to index
    %c0_4 = arith.constant 0 : index
    %21 = vector.load %arg6[%20, %c0_4] : memref<8x32xf32, #tpu.memory_space<vmem>>, vector<1x32xf32>
    tpu.vector_store %arg6[%20, %c0_4], %19 {strides = array<i32>} : memref<8x32xf32, #tpu.memory_space<vmem>>, vector<1x32xf32>,
    %c3_i32 = arith.constant 3 : i32
    %22 = arith.addi %0, %c3_i32 : i32
    %23 = arith.index_cast %22 : i32 to index
    %24 = memref.load %arg1[%23] : memref<8xi32, #tpu.memory_space<smem>>
    %25 = arith.index_cast %24 : i32 to index
    %c0_5 = arith.constant 0 : index
    %26 = vector.load %arg2[%25, %c0_5] : memref<64x32xf32, #tpu.memory_space<vmem>>, vector<1x32xf32>
    %27 = arith.index_cast %c3_i32 : i32 to index
    %c0_6 = arith.constant 0 : index
    %28 = vector.load %arg6[%27, %c0_6] : memref<8x32xf32, #tpu.memory_space<vmem>>, vector<1x32xf32>
    tpu.vector_store %arg6[%27, %c0_6], %26 {strides = array<i32>} : memref<8x32xf32, #tpu.memory_space<vmem>>, vector<1x32xf32>,
    %c4_i32 = arith.constant 4 : i32
    %29 = arith.addi %0, %c4_i32 : i32
    %30 = arith.index_cast %29 : i32 to index
    %31 = memref.load %arg1[%30] : memref<8xi32, #tpu.memory_space<smem>>
    %32 = arith.index_cast %31 : i32 to index
    %c0_7 = arith.constant 0 : index
    %33 = vector.load %arg2[%32, %c0_7] : memref<64x32xf32, #tpu.memory_space<vmem>>, vector<1x32xf32>
    %34 = arith.index_cast %c4_i32 : i32 to index
    %c0_8 = arith.constant 0 : index
    %35 = vector.load %arg6[%34, %c0_8] : memref<8x32xf32, #tpu.memory_space<vmem>>, vector<1x32xf32>
    tpu.vector_store %arg6[%34, %c0_8], %33 {strides = array<i32>} : memref<8x32xf32, #tpu.memory_space<vmem>>, vector<1x32xf32>,
    %c5_i32 = arith.constant 5 : i32
    %36 = arith.addi %0, %c5_i32 : i32
    %37 = arith.index_cast %36 : i32 to index
    %38 = memref.load %arg1[%37] : memref<8xi32, #tpu.memory_space<smem>>
    %39 = arith.index_cast %38 : i32 to index
    %c0_9 = arith.constant 0 : index
    %40 = vector.load %arg2[%39, %c0_9] : memref<64x32xf32, #tpu.memory_space<vmem>>, vector<1x32xf32>
    %41 = arith.index_cast %c5_i32 : i32 to index
    %c0_10 = arith.constant 0 : index
    %42 = vector.load %arg6[%41, %c0_10] : memref<8x32xf32, #tpu.memory_space<vmem>>, vector<1x32xf32>
    tpu.vector_store %arg6[%41, %c0_10], %40 {strides = array<i32>} : memref<8x32xf32, #tpu.memory_space<vmem>>, vector<1x32xf32>,
    %c6_i32 = arith.constant 6 : i32
    %43 = arith.addi %0, %c6_i32 : i32
    %44 = arith.index_cast %43 : i32 to index
    %45 = memref.load %arg1[%44] : memref<8xi32, #tpu.memory_space<smem>>
    %46 = arith.index_cast %45 : i32 to index
    %c0_11 = arith.constant 0 : index
    %47 = vector.load %arg2[%46, %c0_11] : memref<64x32xf32, #tpu.memory_space<vmem>>, vector<1x32xf32>
    %48 = arith.index_cast %c6_i32 : i32 to index
    %c0_12 = arith.constant 0 : index
    %49 = vector.load %arg6[%48, %c0_12] : memref<8x32xf32, #tpu.memory_space<vmem>>, vector<1x32xf32>
    tpu.vector_store %arg6[%48, %c0_12], %47 {strides = array<i32>} : memref<8x32xf32, #tpu.memory_space<vmem>>, vector<1x32xf32>,
    %c7_i32 = arith.constant 7 : i32
    %50 = arith.addi %0, %c7_i32 : i32
    %51 = arith.index_cast %50 : i32 to index
    %52 = memref.load %arg1[%51] : memref<8xi32, #tpu.memory_space<smem>>
    %53 = arith.index_cast %52 : i32 to index
    %c0_13 = arith.constant 0 : index
    %54 = vector.load %arg2[%53, %c0_13] : memref<64x32xf32, #tpu.memory_space<vmem>>, vector<1x32xf32>
    %55 = arith.index_cast %c7_i32 : i32 to index
    %c0_14 = arith.constant 0 : index
    %56 = vector.load %arg6[%55, %c0_14] : memref<8x32xf32, #tpu.memory_space<vmem>>, vector<1x32xf32>
    tpu.vector_store %arg6[%55, %c0_14], %54 {strides = array<i32>} : memref<8x32xf32, #tpu.memory_space<vmem>>, vector<1x32xf32>,
    %c8_i32_15 = arith.constant 8 : i32
    %c0_16 = arith.constant 0 : index
    %c0_17 = arith.constant 0 : index
    %57 = vector.load %arg6[%c0_16, %c0_17] : memref<8x32xf32, #tpu.memory_space<vmem>>, vector<8x32xf32>
    %c0_18 = arith.constant 0 : index
    %c0_19 = arith.constant 0 : index
    %58 = vector.load %arg3[%c0_18, %c0_19] : memref<32x128xf32, #tpu.memory_space<vmem>>, vector<32x128xf32>
    %cst = arith.constant dense<0.000000e+00> : vector<8x128xf32>
    %59 = tpu.matmul %57, %58, %cst {dimension_numbers = #tpu.dot_dimension_numbers<[1], [0], [0], [1], [0, 0, 1, 1], [], []>} : vector<8x32xf32>, vector<32x128xf32>, vector<8x128xf32> -> vector<8x128xf32>
    %c0_20 = arith.constant 0 : index
    %c0_21 = arith.constant 0 : index
    %60 = vector.load %arg4[%c0_20, %c0_21] : memref<1x128xf32, #tpu.memory_space<vmem>>, vector<1x128xf32>
    %61 = vector.broadcast %60 : vector<1x128xf32> to vector<8x128xf32>
    %62 = arith.addf %59, %61 : vector<8x128xf32>
    %63 = vector.extract_strided_slice %62 {offsets = [0, 0], sizes = [8, 2], strides = [1, 1]} : vector<8x128xf32> to vector<8x2xf32>
    %c0_22 = arith.constant 0 : index
    %c0_23 = arith.constant 0 : index
    %64 = vector.load %arg5[%c0_22, %c0_23] : memref<8x2xf32, #tpu.memory_space<vmem>>, vector<8x2xf32>
    tpu.vector_store %arg5[%c0_22, %c0_23], %63 {strides = array<i32>} : memref<8x2xf32, #tpu.memory_space<vmem>>, vector<8x2xf32>,
    return
  }
  func.func @transform_0(%arg0: i32, %arg1: memref<8xi32, #tpu.memory_space<smem>>) -> (i32, i32) {
    %c0_i32 = arith.constant 0 : i32
    %c0_i32_0 = arith.constant 0 : i32
    %c0_i32_1 = arith.constant 0 : i32
    return %c0_i32, %c0_i32_0 : i32, i32
  }
  func.func @transform_1(%arg0: i32, %arg1: memref<8xi32, #tpu.memory_space<smem>>) -> (i32, i32) {
    %c0_i32 = arith.constant 0 : i32
    %c0_i32_0 = arith.constant 0 : i32
    %c0_i32_1 = arith.constant 0 : i32
    return %c0_i32, %c0_i32_0 : i32, i32
  }
  func.func @transform_2(%arg0: i32, %arg1: memref<8xi32, #tpu.memory_space<smem>>) -> (i32, i32) {
    %c0_i32 = arith.constant 0 : i32
    %c0_i32_0 = arith.constant 0 : i32
    %c0_i32_1 = arith.constant 0 : i32
    return %c0_i32, %c0_i32_0 : i32, i32
  }
  func.func @transform_3(%arg0: i32, %arg1: memref<8xi32, #tpu.memory_space<smem>>) -> (i32, i32) {
    %c0_i32 = arith.constant 0 : i32
    %c0_i32_0 = arith.constant 0 : i32
    return %arg0, %c0_i32 : i32, i32
  }
}

</mosaic_0001>

<bundles_post_ra>
// kernel: tpu_custom_call.1
= control target key start
LH: loop header
LB: loop body
LE: loop exit
PB: predicated region body
PF: predicated region fallthrough
CT: control target
= control target key end

     0   :  { %s293_s0 = inlined_call_operand.vmem [shape: s32[8], index: 0, kind: input, shape index: {}]   ;;  %s294_s1 = inlined_call_operand.vmem [shape: f32[64,32], index: 1, kind: input, shape index: {}]   ;;  %s295_s2 = inlined_call_operand.vmem [shape: f32[32,128], index: 2, kind: input, shape index: {}]   ;;  %s296_s3 = inlined_call_operand.vmem [shape: f32[1,128], index: 3, kind: input, shape index: {}]   ;;  %s297_s4 = inlined_call_operand.vmem [shape: f32[8,2], index: 4, kind: output, shape index: {}]  }
   0x1   :  { %s9_s17 = sshll.u32 %s293_s0, 4  ;;  %s10_s17 = int_to_ptr.vmem [resolvable:$true] %s9_s17 }
   0x2   :  { %s197_s18 = scalar_lea.vmem %s10_s17, 16  ;;  %p202_p1 = scmp.lt.s32.totalorder %s10_s17, %s10_s17 }
   0x3   :  { %p198_p0 = scmp.ne.s32.totalorder %s10_s17, %s197_s18  ;;  %p203_p2 = scmp.lt.s32.totalorder %s197_s18, %s197_s18 }
   0x5   :  { %p204_p3 = por %p203_p2, %p202_p1 }
   0x7   :  { %p205_p4 = pnand %p204_p3, %p198_p0 }
   0x9   :  { %208 = shalt.err (!%p205_p4)  }
   0xa   :  { %s211_s19 = smov [#allocation4]  }
   0xb   :  { %12 = dma.vmem_to_smem %s10_s17, 16, %s211_s19, [#allocation3] }
   0xc   :  { %209 = dma.done.wait [#allocation3], 16 }
   0xd   :  { %210 = vsyncadd [#allocation3], 4294967280 }
   0xe   :  { %14 = sfence }
   0xf   :  { %v63_v0 = vld [vmem:[%s295_s2] sm:$0xff]  ;;  %v64_v1 = vld [vmem:[%s295_s2 + $0x8] sm:$0xff]  ;;  %v65_v2 = vld [vmem:[%s295_s2 + $0x10] sm:$0xff]  ;;  %v212_v3 = vmov 0.0|0.0   ;;  %vm213_vm0 = vmmov 0   ;;  %v214_v6 = vmov 0.0  }
  0x10   :  { %187 = vmatprep.subr.bf16.mxu0 %v212_v3  ;;  %v188_v4 = vpack.c.bf16 %v64_v1, %v63_v0  ;;  %v66_v5 = vld [vmem:[%s295_s2 + $0x18] sm:$0xff]  ;;  %184 = vmatprep.mubr.msk.f32.mxu0 %vm213_vm0, %v214_v6  ;;  %s22_s27 = sld [smem:[#allocation4]]  ;;  %s162_s28 = sld [smem:[#allocation4 + $0x1]]  ;;  %vm25_vm1 = vcmask 253952   ;;  %vm74_vm2 = vcmask 261120   ;;  %vm148_vm3 = vcmask 15360  }
  0x11   :  { %s163_s29 = sld [smem:[#allocation4 + $0x2]]  ;;  %s164_s30 = sld [smem:[#allocation4 + $0x3]]  ;;  %v191_v7 = vpack.c.bf16 %v66_v5, %v65_v2  ;;  %v169_v17 = vld [vmem:[%s296_s3] ss:$0 sm:$0xff] }
  0x12   :  { %189 = vmatpush3.bf16.msra.mxu0 %v188_v4  ;;  %s165_s5 = sld [smem:[#allocation4 + $0x4]]  ;;  %s166_s6 = sld [smem:[#allocation4 + $0x5]] }
  0x13   :  { %190 = vmatprep.subr.bf16.mxu0 %v212_v3  ;;  %s167_s7 = sld [smem:[#allocation4 + $0x6]]  ;;  %s168_s8 = sld [smem:[#allocation4 + $0x7]] }
  0x16   :  { %192 = vmatpush3.bf16.msra.mxu0 %v191_v7  ;;  %s23_s2 = scalar_lea.vmem %s294_s1, %s22_s27  ;;  %s29_s13 = scalar_lea.vmem %s294_s1, %s162_s28 }
  0x17   :  { %v24_v8 = vld [vmem:[%s23_s2] sm:$0x1]  ;;  %s34_s16 = scalar_lea.vmem %s294_s1, %s163_s29  ;;  %s39_s19 = scalar_lea.vmem %s294_s1, %s164_s30 }
  0x18   :  { %v30_v9 = vld [vmem:[%s29_s13] sm:$0x1]  ;;  %26 = vst.msk [vmem:[#allocation2] sm:$0x1] %vm25_vm1, %v24_v8  ;;  %s44_s22 = scalar_lea.vmem %s294_s1, %s165_s5  ;;  %s49_s24 = scalar_lea.vmem %s294_s1, %s166_s6 }
  0x19   :  { %31 = vst.msk [vmem:[#allocation2 + $0x1] sm:$0x1] %vm25_vm1, %v30_v9  ;;  %v35_v10 = vld [vmem:[%s34_s16] sm:$0x1]  ;;  %s54_s27 = scalar_lea.vmem %s294_s1, %s167_s7  ;;  %s59_s30 = scalar_lea.vmem %s294_s1, %s168_s8 }
  0x1a   :  { %v40_v11 = vld [vmem:[%s39_s19] sm:$0x1]  ;;  %36 = vst.msk [vmem:[#allocation2 + $0x2] sm:$0x1] %vm25_vm1, %v35_v10 }
  0x1b   :  { %41 = vst.msk [vmem:[#allocation2 + $0x3] sm:$0x1] %vm25_vm1, %v40_v11  ;;  %v45_v12 = vld [vmem:[%s44_s22] sm:$0x1] }
  0x1c   :  { %v50_v13 = vld [vmem:[%s49_s24] sm:$0x1]  ;;  %46 = vst.msk [vmem:[#allocation2 + $0x4] sm:$0x1] %vm25_vm1, %v45_v12 }
  0x1d   :  { %51 = vst.msk [vmem:[#allocation2 + $0x5] sm:$0x1] %vm25_vm1, %v50_v13  ;;  %v55_v14 = vld [vmem:[%s54_s27] sm:$0x1] }
  0x1e   :  { %v60_v15 = vld [vmem:[%s59_s30] sm:$0x1]  ;;  %56 = vst.msk [vmem:[#allocation2 + $0x6] sm:$0x1] %vm25_vm1, %v55_v14 }
  0x1f   :  { %61 = vst.msk [vmem:[#allocation2 + $0x7] sm:$0x1] %vm25_vm1, %v60_v15 }
  0x26   :  { %v62_v16 = vld [vmem:[#allocation2] sm:$0xff] }
  0x27   :  { %185 = vmatmul.mubr.msk.f32.vlgmr.msra.gmra.mrb[0].mxu0 %vm74_vm2, %v62_v16 }
  0xfa   :  { %v144_v18 = vpop.f32.mrb[0].mxu0 }
  0xfb   :  { %v145_v19 = vadd.f32 %v169_v17, %v144_v18  ;;  %v186_v20 = vpop.f32.mrb[1].mxu0 }
  0xfd   :  { %149 = vst.msk [vmem:[%s297_s4] sm:$0xff] %vm148_vm3, %v145_v19 }

</bundles_post_ra>
